<compile_context>
chip_gen: v7x
topology: tpu7x:2x2x1
jax: 0.10.0
libtpu: 0.0.40
codegen_flags: <defaults>
</compile_context>

<pallas_src>
import functools

import jax
import jax.numpy as jnp
from jax.experimental import pallas as pl
from jax.experimental.pallas import tpu as pltpu


def _head_kernel(*refs, eps, has_mask):
    if has_mask:
        (x_ref, mask_ref, gamma_ref, beta_ref, w_ref, b_ref,
         logp_ref, logits_ref) = refs
    else:
        (x_ref, gamma_ref, beta_ref, w_ref, b_ref,
         logp_ref, logits_ref) = refs
        mask_ref = None

    # Pooler-output tile: [TB, H] bf16 in HBM, compute stats in f32.
    x = x_ref[...].astype(jnp.float32)

    # --- Dropout(p=0.3), training only -------------------------------------
    # Precomputed scaled keep-mask (0 or 1/(1-p)), bf16, multiplied in-kernel.
    if mask_ref is not None:
        x = x * mask_ref[...].astype(jnp.float32)

    # --- LayerNorm over hidden dim (fused single-pass statistics, f32) -----
    inv_h = 1.0 / x.shape[-1]
    s = jnp.sum(x, axis=-1, keepdims=True)
    s2 = jnp.sum(x * x, axis=-1, keepdims=True)
    mean = s * inv_h
    var = s2 * inv_h - mean * mean
    x_hat = (x - mean) * jax.lax.rsqrt(var + eps)
    y = x_hat * gamma_ref[...] + beta_ref[...]

    # --- Linear: hidden -> padded label width (bf16 MXU, f32 accumulate) ---
    logits = jnp.dot(y.astype(jnp.bfloat16), w_ref[...],
                     preferred_element_type=jnp.float32) + b_ref[...]  # [TB, Lp]

    # --- LogSoftmax over labels --------------------------------------------
    # Padded columns carry a -1e30 bias, so exp(shifted) == 0 there and they
    # do not affect max / denominator.
    m = jnp.max(logits, axis=-1, keepdims=True)
    shifted = logits - m
    lse = jnp.log(jnp.sum(jnp.exp(shifted), axis=-1, keepdims=True))
    logp = shifted - lse

    logits_ref[...] = logits.astype(logits_ref.dtype)
    logp_ref[...] = logp.astype(logp_ref.dtype)


def prepare_head_params(gamma, beta, weight, bias):
    """Pad/cast head parameters once (hoisted out of the per-call path).

    weight is [H, L] (transposed relative to nn.Linear.weight).
    """
    H, L = weight.shape
    L_pad = ((L + 127) // 128) * 128
    # Zero weight columns and -1e30 bias in the pad -> log-softmax ignores it.
    w_pad = (jnp.zeros((H, L_pad), jnp.float32)
             .at[:, :L].set(weight.astype(jnp.float32))
             .astype(jnp.bfloat16))                                   # MXU-native
    b_pad = (jnp.full((1, L_pad), -1e30, jnp.float32)
             .at[0, :L].set(bias.astype(jnp.float32)))
    return {
        "gamma": gamma.reshape(1, H).astype(jnp.float32),
        "beta": beta.reshape(1, H).astype(jnp.float32),
        "w": w_pad,
        "b": b_pad,
        "num_labels": L,
    }


def _choose_block_b(B, max_block=1024):
    """Largest batch tile (multiple of 8, divides B, <= max_block).

    A single grid step is fine on 1-TC chips (v5e/v6e); when more than one
    step is needed, prefer an even step count so the "parallel" batch axis
    splits evenly across v7x's two TensorCores."""
    assert B % 8 == 0, "batch must be a multiple of 8"
    candidates = [bb for bb in range(8, min(B, max_block) + 1, 8) if B % bb == 0]
    good = [bb for bb in candidates if (B // bb == 1) or (B // bb) % 2 == 0]
    return max(good) if good else max(candidates)


def base_model_head_apply(pooler_output, params, *, eps=1e-5, dropout_p=0.3,
                          training=False, rng=None, block_b=None,
                          out_dtype=jnp.bfloat16):
    """Apply BaseModel's classification head (Pallas kernel).

    Args:
      pooler_output: [B, H] float array — pretrained model pooler output.
      params:        dict from prepare_head_params (padded/cast once).
      rng:           jax PRNG key for dropout (training mode only).

    Returns:
      (log_probs [B, L], logits [B, L]) in out_dtype.
    """
    B, H = pooler_output.shape
    L = params["num_labels"]
    L_pad = params["w"].shape[1]
    assert params["w"].shape[0] == H
    assert B % 8 == 0

    if block_b is None:
        block_b = _choose_block_b(B)
    assert B % block_b == 0 and block_b % 8 == 0

    # Dominant HBM stream: read the activations as bf16.
    x = pooler_output.astype(jnp.bfloat16)

    has_mask = bool(training and dropout_p > 0.0)

    inputs = [x]
    in_specs = [pl.BlockSpec((block_b, H), lambda i: (i, 0))]
    if has_mask:
        if rng is None:
            rng = jax.random.PRNGKey(0)
        keep = jax.random.bernoulli(rng, 1.0 - dropout_p, (B, H))
        mask = (keep.astype(jnp.float32) *
                (1.0 / (1.0 - dropout_p))).astype(jnp.bfloat16)
        inputs.append(mask)
        in_specs.append(pl.BlockSpec((block_b, H), lambda i: (i, 0)))
    inputs += [params["gamma"], params["beta"], params["w"], params["b"]]
    in_specs += [
        pl.BlockSpec((1, H), lambda i: (0, 0)),        # gamma (f32)
        pl.BlockSpec((1, H), lambda i: (0, 0)),        # beta  (f32)
        pl.BlockSpec((H, L_pad), lambda i: (0, 0)),    # weight (bf16, padded)
        pl.BlockSpec((1, L_pad), lambda i: (0, 0)),    # bias   (f32, padded)
    ]

    out_specs = [
        pl.BlockSpec((block_b, L_pad), lambda i: (i, 0)),
        pl.BlockSpec((block_b, L_pad), lambda i: (i, 0)),
    ]
    out_shapes = (
        jax.ShapeDtypeStruct((B, L_pad), out_dtype),   # log-probs (padded)
        jax.ShapeDtypeStruct((B, L_pad), out_dtype),   # logits    (padded)
    )

    # VMEM limit from actual (double-buffered) footprint, not a blanket value.
    out_bytes = jnp.dtype(out_dtype).itemsize
    per_step = (
        2 * block_b * H * 2                                  # x tile (bf16)
        + (2 * block_b * H * 2 if has_mask else 0)           # dropout mask
        + 2 * H * L_pad * 2                                  # weight (bf16)
        + 2 * (2 * H * 4 + L_pad * 4)                        # gamma/beta/bias
        + 2 * 2 * block_b * L_pad * out_bytes                # two output tiles
    )
    vmem_limit = min(max(2 * per_step, 4 * 1024 * 1024), 64 * 1024 * 1024)

    kernel = functools.partial(_head_kernel, eps=eps, has_mask=has_mask)

    logp_pad, logits_pad = pl.pallas_call(
        kernel,
        out_shape=out_shapes,
        grid=(B // block_b,),
        in_specs=in_specs,
        out_specs=out_specs,
        compiler_params=pltpu.CompilerParams(
            dimension_semantics=("parallel",),
            vmem_limit_bytes=vmem_limit,
        ),
    )(*inputs)

    # Drop the padded label columns.
    return logp_pad[:, :L], logits_pad[:, :L]


def base_model_head(pooler_output, gamma, beta, weight, bias, **kwargs):
    """Convenience wrapper: prepares params and applies the head.

    For repeated calls, call prepare_head_params() once and use
    base_model_head_apply() directly to avoid re-padding the weights."""
    params = prepare_head_params(gamma, beta, weight, bias)
    return base_model_head_apply(pooler_output, params, **kwargs)


if __name__ == "__main__":
    # Small, TPU-tile-friendly shapes consistent with the module:
    #   batch = 16, hidden_size = 128, num_labels = 8.
    B, H, L = 16, 128, 8

    key = jax.random.PRNGKey(0)
    k_x, k_w, k_b, k_d = jax.random.split(key, 4)

    # Synthetic pooler_output of the (unimplemented) pretrained model
    # (tanh-bounded, like a BERT pooler).
    pooler_output = jnp.tanh(jax.random.normal(k_x, (B, H), dtype=jnp.float32))

    # LayerNorm params: PyTorch default init (ones / zeros).
    gamma = jnp.ones((H,), dtype=jnp.float32)
    beta = jnp.zeros((H,), dtype=jnp.float32)

    # Linear(H, L) params, deterministic init. Stored as [H, L] (transposed).
    bound = 1.0 / jnp.sqrt(H)
    weight = jax.random.uniform(k_w, (H, L), jnp.float32, -bound, bound)
    bias = jax.random.uniform(k_b, (L,), jnp.float32, -bound, bound)

    # Params padded/cast once (hoisted out of the per-call path).
    params = prepare_head_params(gamma, beta, weight, bias)

    # Eval mode (dropout = identity), checked against a plain-JAX reference.
    log_probs, logits = base_model_head_apply(pooler_output, params,
                                              training=False)
    jax.block_until_ready((log_probs, logits))

    # Reference matching the kernel's precision strategy (bf16 activations,
    # f32 LayerNorm, bf16 matmul operands, f32 accumulation).
    def ref(x):
        x = x.astype(jnp.bfloat16).astype(jnp.float32)
        mean = jnp.mean(x, axis=-1, keepdims=True)
        var = jnp.mean((x - mean) ** 2, axis=-1, keepdims=True)
        y = (x - mean) * jax.lax.rsqrt(var + 1e-5) * gamma + beta
        lg = jnp.dot(y.astype(jnp.bfloat16), weight.astype(jnp.bfloat16),
                     preferred_element_type=jnp.float32) + bias
        return jax.nn.log_softmax(lg, axis=1), lg

    ref_logp, ref_logits = ref(pooler_output)
    assert logits.shape == (B, L) and log_probs.shape == (B, L)
    assert jnp.allclose(logits.astype(jnp.float32), ref_logits,
                        atol=3e-2, rtol=3e-2)
    assert jnp.allclose(log_probs.astype(jnp.float32), ref_logp,
                        atol=3e-2, rtol=3e-2)

    # Training path (fused dropout via precomputed scaled keep-mask) also runs.
    logp_tr, logits_tr = base_model_head_apply(pooler_output, params,
                                               training=True, rng=k_d)
    jax.block_until_ready((logp_tr, logits_tr))
    assert logits_tr.shape == (B, L)
    assert bool(jnp.isfinite(logits_tr.astype(jnp.float32)).all())
    assert bool(jnp.isfinite(logp_tr.astype(jnp.float32)).all())

    print("KERNEL_OK")
</pallas_src>

<mosaic_0001>
module attributes {stable_mosaic.version = 11 : i64} {
  func.func @_head_kernel(%arg0: i32, %arg1: memref<16x128xbf16, #tpu.memory_space<vmem>>, %arg2: memref<1x128xf32, #tpu.memory_space<vmem>>, %arg3: memref<1x128xf32, #tpu.memory_space<vmem>>, %arg4: memref<128x128xbf16, #tpu.memory_space<vmem>>, %arg5: memref<1x128xf32, #tpu.memory_space<vmem>>, %arg6: memref<16x128xbf16, #tpu.memory_space<vmem>>, %arg7: memref<16x128xbf16, #tpu.memory_space<vmem>>) attributes {dimension_semantics = [#tpu.dimension_semantics<parallel>], iteration_bounds = array<i64: 1>, scalar_prefetch = 0 : i64, scratch_operands = 0 : i64, tpu.core_type = #tpu.core_type<tc>, window_params = [{transform_indices = @transform_0, window_bounds = array<i64: 16, 128>}, {pipeline_mode = #tpu.pipeline_mode<synchronous>, transform_indices = @transform_1, window_bounds = array<i64: 1, 128>}, {pipeline_mode = #tpu.pipeline_mode<synchronous>, transform_indices = @transform_2, window_bounds = array<i64: 1, 128>}, {pipeline_mode = #tpu.pipeline_mode<synchronous>, transform_indices = @transform_3, window_bounds = array<i64: 128, 128>}, {pipeline_mode = #tpu.pipeline_mode<synchronous>, transform_indices = @transform_4, window_bounds = array<i64: 1, 128>}, {transform_indices = @transform_5, window_bounds = array<i64: 16, 128>}, {transform_indices = @transform_6, window_bounds = array<i64: 16, 128>}]} {
    %c0 = arith.constant 0 : index
    %c0_0 = arith.constant 0 : index
    %0 = vector.load %arg1[%c0, %c0_0] : memref<16x128xbf16, #tpu.memory_space<vmem>>, vector<16x128xbf16>
    %1 = arith.extf %0 : vector<16x128xbf16> to vector<16x128xf32>
    %cst = arith.constant dense<0.000000e+00> : vector<16xf32>
    %2 = vector.multi_reduction <add>, %1, %cst [1] : vector<16x128xf32> to vector<16xf32>
    %3 = vector.shape_cast %2 : vector<16xf32> to vector<16x1xf32>
    %4 = arith.mulf %1, %1 : vector<16x128xf32>
    %cst_1 = arith.constant dense<0.000000e+00> : vector<16xf32>
    %5 = vector.multi_reduction <add>, %4, %cst_1 [1] : vector<16x128xf32> to vector<16xf32>
    %6 = vector.shape_cast %5 : vector<16xf32> to vector<16x1xf32>
    %cst_2 = arith.constant 7.812500e-03 : f32
    %7 = vector.broadcast %cst_2 : f32 to vector<16x1xf32>
    %8 = arith.mulf %3, %7 : vector<16x1xf32>
    %cst_3 = arith.constant 7.812500e-03 : f32
    %9 = vector.broadcast %cst_3 : f32 to vector<16x1xf32>
    %10 = arith.mulf %6, %9 : vector<16x1xf32>
    %11 = arith.mulf %8, %8 : vector<16x1xf32>
    %12 = arith.subf %10, %11 : vector<16x1xf32>
    %13 = vector.broadcast %8 : vector<16x1xf32> to vector<16x128xf32>
    %14 = arith.subf %1, %13 : vector<16x128xf32>
    %cst_4 = arith.constant 9.99999974E-6 : f32
    %15 = vector.broadcast %cst_4 : f32 to vector<16x1xf32>
    %16 = arith.addf %12, %15 : vector<16x1xf32>
    %17 = math.rsqrt %16 : vector<16x1xf32>
    %18 = vector.broadcast %17 : vector<16x1xf32> to vector<16x128xf32>
    %19 = arith.mulf %14, %18 : vector<16x128xf32>
    %c0_5 = arith.constant 0 : index
    %c0_6 = arith.constant 0 : index
    %20 = vector.load %arg2[%c0_5, %c0_6] : memref<1x128xf32, #tpu.memory_space<vmem>>, vector<1x128xf32>
    %21 = vector.broadcast %20 : vector<1x128xf32> to vector<16x128xf32>
    %22 = arith.mulf %19, %21 : vector<16x128xf32>
    %c0_7 = arith.constant 0 : index
    %c0_8 = arith.constant 0 : index
    %23 = vector.load %arg3[%c0_7, %c0_8] : memref<1x128xf32, #tpu.memory_space<vmem>>, vector<1x128xf32>
    %24 = vector.broadcast %23 : vector<1x128xf32> to vector<16x128xf32>
    %25 = arith.addf %22, %24 : vector<16x128xf32>
    %26 = arith.truncf %25 : vector<16x128xf32> to vector<16x128xbf16>
    %c0_9 = arith.constant 0 : index
    %c0_10 = arith.constant 0 : index
    %27 = vector.load %arg4[%c0_9, %c0_10] : memref<128x128xbf16, #tpu.memory_space<vmem>>, vector<128x128xbf16>
    %cst_11 = arith.constant dense<0.000000e+00> : vector<16x128xf32>
    %28 = tpu.matmul %26, %27, %cst_11 {dimension_numbers = #tpu.dot_dimension_numbers<[1], [0], [0], [1], [0, 0, 1, 1], [], []>} : vector<16x128xbf16>, vector<128x128xbf16>, vector<16x128xf32> -> vector<16x128xf32>
    %c0_12 = arith.constant 0 : index
    %c0_13 = arith.constant 0 : index
    %29 = vector.load %arg5[%c0_12, %c0_13] : memref<1x128xf32, #tpu.memory_space<vmem>>, vector<1x128xf32>
    %30 = vector.broadcast %29 : vector<1x128xf32> to vector<16x128xf32>
    %31 = arith.addf %28, %30 : vector<16x128xf32>
    %cst_14 = arith.constant dense<0xFF800000> : vector<16xf32>
    %32 = vector.multi_reduction <maximumf>, %31, %cst_14 [1] : vector<16x128xf32> to vector<16xf32>
    %33 = vector.shape_cast %32 : vector<16xf32> to vector<16x1xf32>
    %34 = vector.broadcast %33 : vector<16x1xf32> to vector<16x128xf32>
    %35 = arith.subf %31, %34 : vector<16x128xf32>
    %36 = math.exp %35 : vector<16x128xf32>
    %cst_15 = arith.constant dense<0.000000e+00> : vector<16xf32>
    %37 = vector.multi_reduction <add>, %36, %cst_15 [1] : vector<16x128xf32> to vector<16xf32>
    %38 = vector.shape_cast %37 : vector<16xf32> to vector<16x1xf32>
    %39 = math.log %38 : vector<16x1xf32>
    %40 = vector.broadcast %39 : vector<16x1xf32> to vector<16x128xf32>
    %41 = arith.subf %35, %40 : vector<16x128xf32>
    %42 = arith.truncf %31 : vector<16x128xf32> to vector<16x128xbf16>
    %c0_16 = arith.constant 0 : index
    %c0_17 = arith.constant 0 : index
    %43 = vector.load %arg7[%c0_16, %c0_17] : memref<16x128xbf16, #tpu.memory_space<vmem>>, vector<16x128xbf16>
    tpu.vector_store %arg7[%c0_16, %c0_17], %42 {strides = array<i32>} : memref<16x128xbf16, #tpu.memory_space<vmem>>, vector<16x128xbf16>,
    %44 = arith.truncf %41 : vector<16x128xf32> to vector<16x128xbf16>
    %c0_18 = arith.constant 0 : index
    %c0_19 = arith.constant 0 : index
    %45 = vector.load %arg6[%c0_18, %c0_19] : memref<16x128xbf16, #tpu.memory_space<vmem>>, vector<16x128xbf16>
    tpu.vector_store %arg6[%c0_18, %c0_19], %44 {strides = array<i32>} : memref<16x128xbf16, #tpu.memory_space<vmem>>, vector<16x128xbf16>,
    return
  }
  func.func @transform_0(%arg0: i32) -> (i32, i32) {
    %c0_i32 = arith.constant 0 : i32
    %c0_i32_0 = arith.constant 0 : i32
    return %arg0, %c0_i32 : i32, i32
  }
  func.func @transform_1(%arg0: i32) -> (i32, i32) {
    %c0_i32 = arith.constant 0 : i32
    %c0_i32_0 = arith.constant 0 : i32
    %c0_i32_1 = arith.constant 0 : i32
    return %c0_i32, %c0_i32_0 : i32, i32
  }
  func.func @transform_2(%arg0: i32) -> (i32, i32) {
    %c0_i32 = arith.constant 0 : i32
    %c0_i32_0 = arith.constant 0 : i32
    %c0_i32_1 = arith.constant 0 : i32
    return %c0_i32, %c0_i32_0 : i32, i32
  }
  func.func @transform_3(%arg0: i32) -> (i32, i32) {
    %c0_i32 = arith.constant 0 : i32
    %c0_i32_0 = arith.constant 0 : i32
    %c0_i32_1 = arith.constant 0 : i32
    return %c0_i32, %c0_i32_0 : i32, i32
  }
  func.func @transform_4(%arg0: i32) -> (i32, i32) {
    %c0_i32 = arith.constant 0 : i32
    %c0_i32_0 = arith.constant 0 : i32
    %c0_i32_1 = arith.constant 0 : i32
    return %c0_i32, %c0_i32_0 : i32, i32
  }
  func.func @transform_5(%arg0: i32) -> (i32, i32) {
    %c0_i32 = arith.constant 0 : i32
    %c0_i32_0 = arith.constant 0 : i32
    return %arg0, %c0_i32 : i32, i32
  }
  func.func @transform_6(%arg0: i32) -> (i32, i32) {
    %c0_i32 = arith.constant 0 : i32
    %c0_i32_0 = arith.constant 0 : i32
    return %arg0, %c0_i32 : i32, i32
  }
}

</mosaic_0001>

<bundles_post_ra>
// kernel: tpu_custom_call.1
= control target key start
LH: loop header
LB: loop body
LE: loop exit
PB: predicated region body
PF: predicated region fallthrough
CT: control target
= control target key end

     0   :  { %12 = vsyncpa [#allocation3], 0  ;;  %s586_s0 = inlined_call_operand.hbm [shape: bf16[16,128], index: 0, kind: input, shape index: {}]   ;;  %s587_s1 = inlined_call_operand.vmem [shape: f32[1,128], index: 1, kind: input, shape index: {}]   ;;  %s588_s2 = inlined_call_operand.vmem [shape: f32[1,128], index: 2, kind: input, shape index: {}]   ;;  %s589_s3 = inlined_call_operand.hbm [shape: bf16[128,128], index: 3, kind: input, shape index: {}]   ;;  %s590_s4 = inlined_call_operand.vmem [shape: f32[1,128], index: 4, kind: input, shape index: {}]   ;;  %s591_s5 = inlined_call_operand.hbm [shape: bf16[16,128], index: 5, kind: output, shape index: {0}]   ;;  %s592_s6 = inlined_call_operand.hbm [shape: bf16[16,128], index: 6, kind: output, shape index: {1}]  }
   0x1   :  { %13 = vsyncpa [#allocation6], 0 }
   0x2   :  { %14 = vsyncpa [#allocation4], 0 }
   0x3   :  { %15 = vsyncpa [#allocation9], 0  ;;  %s474_s21 = smov [#allocation2]   ;;  %s378_s25 = scalar_lea.hbm %s586_s0, 128 }
   0x4   :  { %s21_s22 = sshll.u32 %s474_s21, 4  ;;  %p379_p0 = scmp.ne.s32.totalorder %s586_s0, %s378_s25  ;;  %s22_s22 = int_to_ptr.vmem [resolvable:$true] %s21_s22 }
   0x5   :  { %p382_p1 = scmp.lt.u32.totalorder %s378_s25, %s586_s0 }
   0x7   :  { %p384_p2 = pnand %p382_p1, %p379_p0 }
   0x9   :  { %387 = shalt.err (!%p384_p2)
}
   0xa   :  { %s388_s30 = scalar_lea.vmem %s22_s22, 128  ;;  %p393_p4 = scmp.lt.s32.totalorder %s22_s22, %s22_s22 }
   0xb   :  { %p389_p3 = scmp.ne.s32.totalorder %s22_s22, %s388_s30  ;;  %p394_p5 = scmp.lt.s32.totalorder %s388_s30, %s388_s30 }
   0xd   :  { %p395_p6 = por %p394_p5, %p393_p4 }
   0xf   :  { %p396_p7 = pnand %p395_p6, %p389_p3 }
  0x11   :  { %399 = shalt.err (!%p396_p7)
}
  0x12   :  { %s475_s7 = smov 64   ;;  %s476_s8 = smov 4  }
  0x13   :  { %27 = dma.hbm_to_vmem [thread:$0]  %s586_s0, 128, %s22_s22, [#allocation3], %s475_s7, %s475_s7, %s476_s8  }
  0x14   :  { %s477_s11 = smov [#allocation5]   ;;  %s400_s15 = scalar_lea.hbm %s589_s3, 1024 }
  0x15   :  { %s37_s12 = sshll.u32 %s477_s11, 4  ;;  %p401_p8 = scmp.ne.s32.totalorder %s589_s3, %s400_s15  ;;  %s38_s12 = int_to_ptr.vmem [resolvable:$true] %s37_s12 }
  0x16   :  { %p404_p9 = scmp.lt.u32.totalorder %s400_s15, %s589_s3 }
  0x18   :  { %p406_p10 = pnand %p404_p9, %p401_p8 }
  0x1a   :  { %409 = shalt.err (!%p406_p10)
}
  0x1b   :  { %s410_s20 = scalar_lea.vmem %s38_s12, 1024  ;;  %p415_p12 = scmp.lt.s32.totalorder %s38_s12, %s38_s12 }
  0x1c   :  { %p411_p11 = scmp.ne.s32.totalorder %s38_s12, %s410_s20  ;;  %p416_p13 = scmp.lt.s32.totalorder %s410_s20, %s410_s20 }
  0x1e   :  { %p417_p0 = por %p416_p13, %p415_p12 }
  0x20   :  { %p418_p1 = pnand %p417_p0, %p411_p11 }
  0x22   :  { %421 = shalt.err (!%p418_p1)
}
  0x23   :  { %43 = dma.hbm_to_vmem [thread:$0]  %s589_s3, 1024, %s38_s12, [#allocation6], %s475_s7, %s475_s7, %s476_s8  }
  0x24   :  { %466 = dma.done.wait [#allocation3], 128  }
  0x25   :  { %467 = vsyncadd [#allocation3], 4294967168 }
  0x26   :  { %468 = dma.done.wait [#allocation6], 1024  }
  0x27   :  { %469 = vsyncadd [#allocation6], 4294966272  ;;  %v478_v0 = vmov 0.0   ;;  %v308_v1 = vld [vmem:[#allocation2] sm:$0xff]   ;;  %v358_v6 = vld [vmem:[#allocation5] sm:$0xff]   ;;  %vm479_vm0 = vmmov 0  }
  0x28   :  { %330 = vmatprep.subr.bf16.mxu0 %v478_v0  ;;  %v309_v2 = vunpack.c.l.bf16 %v308_v1  ;;  %v310_v3 = vunpack.c.h.bf16 %v308_v1  ;;  %v359_v7 = vld [vmem:[#allocation5 + $0x8] sm:$0xff]   ;;  %v360_v8 = vld [vmem:[#allocation5 + $0x10] sm:$0xff]   ;;  %v361_v9 = vld [vmem:[#allocation5 + $0x18] sm:$0xff]   ;;  %346 = vmatprep.mubr.msk.bf16.mxu0 %vm479_vm0, %v478_v0 }
  0x29   :  { %331 = vmatpush3.bf16.msra.mxu0 %v358_v6  ;;  %v362_v10 = vld [vmem:[#allocation5 + $0x20] sm:$0xff]   ;;  %v363_v11 = vld [vmem:[#allocation5 + $0x28] sm:$0xff]   ;;  %v364_v12 = vld [vmem:[#allocation5 + $0x30] sm:$0xff]  }
  0x2a   :  { %57 = vadd.xlane.f32.xlu0 %v309_v2  ;;  %v61_v4 = vmul.f32 %v309_v2, %v309_v2  ;;  %v62_v5 = vmul.f32 %v310_v3, %v310_v3  ;;  %332 = vmatprep.subr.bf16.mxu0 %v478_v0  ;;  %v365_v13 = vld [vmem:[#allocation5 + $0x38] sm:$0xff]  }
  0x2b   :  { %v288_v31 = vld [vmem:[%s587_s1] ss:$0 sm:$0xff]  ;;  %s480_s1 = smov [#allocation8]  }
  0x2c   :  { %63 = vadd.xlane.f32.xlu1 %v61_v4  ;;  %v289_v36 = vld [vmem:[%s588_s2] ss:$0 sm:$0xff]  ;;  %s271_s2 = sshll.u32 %s480_s1, 4  ;;  %s272_s2 = int_to_ptr.vmem [resolvable:$true] %s271_s2 }
  0x2d   :  { %333 = vmatpush3.bf16.msra.mxu0 %v359_v7  ;;  %v290_v41 = vld [vmem:[%s590_s4] ss:$0 sm:$0xff]  ;;  %s422_s4 = scalar_lea.vmem %s272_s2, 128  ;;  %p427_p3 = scmp.lt.s32.totalorder %s272_s2, %s272_s2 }
  0x2e   :  { %59 = vadd.xlane.f32.xlu0 %v310_v3  ;;  %334 = vmatprep.subr.bf16.mxu0 %v478_v0  ;;  %p423_p2 = scmp.ne.s32.totalorder %s272_s2, %s422_s4  ;;  %p428_p4 = scmp.lt.s32.totalorder %s422_s4, %s422_s4 }
  0x30   :  { %65 = vadd.xlane.f32.xlu1 %v62_v5  ;;  %p429_p5 = por %p428_p4, %p427_p3 }
  0x31   :  { %335 = vmatpush3.bf16.msra.mxu0 %v360_v8 }
  0x32   :  { %336 = vmatprep.subr.bf16.mxu0 %v478_v0  ;;  %p430_p6 = pnand %p429_p5, %p423_p2 }
  0x35   :  { %337 = vmatpush3.bf16.msra.mxu0 %v361_v9 }
  0x36   :  { %338 = vmatprep.subr.bf16.mxu0 %v478_v0 }
  0x39   :  { %339 = vmatpush3.bf16.msra.mxu0 %v362_v10 }
  0x3a   :  { %340 = vmatprep.subr.bf16.mxu0 %v478_v0 }
  0x3d   :  { %341 = vmatpush3.bf16.msra.mxu0 %v363_v11 }
  0x3e   :  { %342 = vmatprep.subr.bf16.mxu0 %v478_v0 }
  0x41   :  { %343 = vmatpush3.bf16.msra.mxu0 %v364_v12 }
  0x42   :  { %344 = vmatprep.subr.bf16.mxu0 %v478_v0 }
  0x45   :  { %345 = vmatpush3.bf16.msra.mxu0 %v365_v13 }
  0xb7   :  { %v58_v14 = vpop.xlane.xlu0 %57 }
  0xb8   :  { %v67_v15 = vmul.f32 0.0078125, %v58_v14 }
  0xb9   :  { %v64_v16 = vpop.xlane.xlu1 %63 }
  0xba   :  { %v71_v17 = vmul.f32 %v67_v15, %v67_v15  ;;  %v69_v18 = vmul.f32 0.0078125, %v64_v16  ;;  %v75_v28 = vsub.f32 %v309_v2, %v67_v15 }
  0xbb   :  { %v60_v19 = vpop.xlane.xlu0 %59 }
  0xbc   :  { %v73_v20 = vsub.f32 %v69_v18, %v71_v17  ;;  %v68_v21 = vmul.f32 0.0078125, %v60_v19 }
  0xbd   :  { %v66_v22 = vpop.xlane.xlu1 %65 }
  0xbe   :  { %v77_v23 = vadd.f32 1e-05, %v73_v20  ;;  %v72_v24 = vmul.f32 %v68_v21, %v68_v21  ;;  %v70_v25 = vmul.f32 0.0078125, %v66_v22  ;;  %v76_v32 = vsub.f32 %v310_v3, %v68_v21 }
  0xc0   :  { %366 = vrsqrt.f32 %v77_v23  ;;  %v74_v26 = vsub.f32 %v70_v25, %v72_v24 }
  0xc2   :  { %v78_v27 = vadd.f32 1e-05, %v74_v26 }
  0xc4   :  { %368 = vrsqrt.f32 %v78_v27 }
  0xca   :  { %v367_v29 = vpop.eup %366 }
  0xcb   :  { %v81_v30 = vmul.f32 %v367_v29, %v75_v28 }
  0xcd   :  { %v90_v35 = vmul.f32 %v288_v31, %v81_v30 }
  0xce   :  { %v369_v33 = vpop.eup %368 }
  0xcf   :  { %v82_v34 = vmul.f32 %v369_v33, %v76_v32  ;;  %v99_v38 = vadd.f32 %v289_v36, %v90_v35 }
  0xd1   :  { %v91_v37 = vmul.f32 %v288_v31, %v82_v34 }
  0xd3   :  { %v100_v39 = vadd.f32 %v289_v36, %v91_v37 }
  0xd5   :  { %v101_v40 = vpack.c.bf16 %v100_v39, %v99_v38 }
  0xd7   :  { %347 = vmatmul.mubr.bf16.vlgmr.msra.gmra.mrb[0].mxu0 %v101_v40 }
 0x1aa   :  { %v207_v42 = vpop.f32.mrb[0].mxu0 }
 0x1ab   :  { %v208_v43 = vadd.f32 %v290_v41, %v207_v42  ;;  %v348_v44 = vpop.f32.mrb[1].mxu0 }
 0x1ac   :  { %v210_v45 = vpop.f32.mrb[2].mxu0 }
 0x1ad   :  { %v211_v46 = vadd.f32 %v290_v41, %v210_v45  ;;  %214 = vmax.xlane.f32.xlu0 %v208_v43  ;;  %v349_v47 = vpop.f32.mrb[3].mxu0 }
 0x1af   :  { %216 = vmax.xlane.f32.xlu1 %v211_v46  ;;  %v314_v48 = vpack.c.bf16 %v211_v46, %v208_v43 }
 0x1b1   :  { %315 = vst [vmem:[#allocation8] sm:$0xff] %v314_v48  }
 0x23a   :  { %v215_v49 = vpop.xlane.xlu0 %214 }
 0x23b   :  { %v218_v50 = vsub.f32 %v208_v43, %v215_v49 }
 0x23c   :  { %v217_v51 = vpop.xlane.xlu1 %216 }
 0x23d   :  { %v220_v52 = vmul.f32 1.442695, %v218_v50  ;;  %v219_v53 = vsub.f32 %v211_v46, %v217_v51 }
 0x23f   :  { %370 = vpow2.f32 %v220_v52  ;;  %v222_v54 = vmul.f32 1.442695, %v219_v53 }
 0x241   :  { %372 = vpow2.f32 %v222_v54 }
 0x249   :  { %v371_v55 = vpop.eup %370 }
 0x24a   :  { %224 = vadd.xlane.f32.xlu0 %v371_v55 }
 0x24b   :  { %v373_v56 = vpop.eup %372 }
 0x24c   :  { %226 = vadd.xlane.f32.xlu1 %v373_v56 }
 0x24d   :  { %433 = shalt.err (!%p430_p6)
}
 0x24e   :  { %s434_s29 = scalar_lea.hbm %s592_s6, 128 }
 0x24f   :  { %p435_p7 = scmp.ne.s32.totalorder %s592_s6, %s434_s29  ;;  %p438_p8 = scmp.lt.u32.totalorder %s434_s29, %s592_s6 }
 0x251   :  { %p440_p9 = pnand %p438_p8, %p435_p7 }
 0x253   :  { %443 = shalt.err (!%p440_p9)
}
 0x254   :  { %277 = dma.vmem_to_hbm [thread:$0]  %s272_s2, 128, %s592_s6, [#allocation9], %s475_s7, %s475_s7, %s476_s8  }
 0x255   :  { %s481_s14 = smov [#allocation7]  }
 0x256   :  { %s259_s15 = sshll.u32 %s481_s14, 4  ;;  %s260_s15 = int_to_ptr.vmem [resolvable:$true] %s259_s15 }
 0x257   :  { %s444_s16 = scalar_lea.vmem %s260_s15, 128  ;;  %p449_p11 = scmp.lt.s32.totalorder %s260_s15, %s260_s15 }
 0x258   :  { %p445_p10 = scmp.ne.s32.totalorder %s260_s15, %s444_s16  ;;  %p450_p12 = scmp.lt.s32.totalorder %s444_s16, %s444_s16 }
 0x25a   :  { %p451_p13 = por %p450_p12, %p449_p11 }
 0x25c   :  { %p452_p0 = pnand %p451_p13, %p445_p10 }
 0x2d7   :  { %v225_v57 = vpop.xlane.xlu0 %224 }
 0x2d8   :  { %374 = vlog2.f32 %v225_v57 }
 0x2d9   :  { %v227_v58 = vpop.xlane.xlu1 %226 }
 0x2da   :  { %376 = vlog2.f32 %v227_v58 }
 0x2e2   :  { %v375_v59 = vpop.eup %374 }
 0x2e3   :  { %v229_v60 = vmul.f32 0.6931472, %v375_v59 }
 0x2e4   :  { %v377_v61 = vpop.eup %376 }
 0x2e5   :  { %v231_v62 = vmul.f32 0.6931472, %v377_v61  ;;  %v232_v63 = vsub.f32 %v218_v50, %v229_v60 }
 0x2e7   :  { %v233_v0 = vsub.f32 %v219_v53, %v231_v62 }
 0x2e9   :  { %v319_v1 = vpack.c.bf16 %v233_v0, %v232_v63 }
 0x2eb   :  { %320 = vst [vmem:[#allocation7] sm:$0xff] %v319_v1  }
 0x2ec   :  { %455 = shalt.err (!%p452_p0)
}
 0x2ed   :  { %s456_s18 = scalar_lea.hbm %s591_s5, 128 }
 0x2ee   :  { %p457_p1 = scmp.ne.s32.totalorder %s591_s5, %s456_s18  ;;  %p460_p2 = scmp.lt.u32.totalorder %s456_s18, %s591_s5 }
 0x2f0   :  { %p462_p3 = pnand %p460_p2, %p457_p1 }
 0x2f2   :  { %465 = shalt.err (!%p462_p3)
}
 0x2f3   :  { %265 = dma.vmem_to_hbm [thread:$0]  %s260_s15, 128, %s591_s5, [#allocation4], %s475_s7, %s475_s7, %s476_s8  }
 0x2f4   :  { %470 = dma.done.wait [#allocation4], 128  }
 0x2f5   :  { %471 = vsyncadd [#allocation4], 4294967168 }
 0x2f6   :  { %472 = dma.done.wait [#allocation9], 128  }
 0x2f7   :  { %473 = vsyncadd [#allocation9], 4294967168 }
 0x2f8   :  { %284 = vsyncpa [#allocation3], 1 }
 0x2f9   :  { %285 = vsyncpa [#allocation6], 1 }
 0x2fa   :  { %286 = vsyncpa [#allocation4], 1 }
 0x2fb   :  { %287 = vsyncpa [#allocation9], 1 }

</bundles_post_ra>
